<compile_context>
chip_gen: v6e
topology: v6e:2x2x1
jax: 0.10.0
libtpu: 0.0.40
codegen_flags: <defaults>
</compile_context>

<pallas_src>
import functools
import math

import jax
import jax.numpy as jnp
from jax.experimental import pallas as pl
from jax.experimental.pallas import tpu as pltpu


def _round_up(n, m):
    return ((n + m - 1) // m) * m


def _pick_fold(in_features, size1, size2, max_fold=16):
    """Smallest fold making the folded input width a multiple of 128 lanes."""
    for f in range(1, max_fold + 1):
        if (f * in_features) % 128 != 0:
            continue
        folded_weight_elems = (f * f * (in_features * size1 + size1 * size2
                                        + size2 * size1) + (f * size1) ** 2)
        if folded_weight_elems * 4 <= 8 * 1024 * 1024:   # keep weights VMEM-friendly
            return f
        break
    return 1


def channel_decoder_kernel(x_ref, w1_ref, b1_ref, w2_ref, b2_ref, w3_ref, b3_ref,
                           ones_ref, o_ref, *, matmul_dtype, feat_scale):
    # Activations / residual / normalize stay in f32; only MXU operands are cast.
    x = x_ref[...]
    if x.dtype != matmul_dtype:
        x = x.astype(matmul_dtype)

    # linear1 (weights already stored in matmul_dtype -> no per-step weight casts)
    x1 = jnp.dot(x, w1_ref[...], preferred_element_type=jnp.float32) + b1_ref[...]
    # relu -> linear2
    x2 = jnp.maximum(x1, 0.0)
    x3 = jnp.dot(x2.astype(matmul_dtype), w2_ref[...],
                 preferred_element_type=jnp.float32) + b2_ref[...]
    # relu -> linear3
    x4 = jnp.maximum(x3, 0.0)
    x5 = jnp.dot(x4.astype(matmul_dtype), w3_ref[...],
                 preferred_element_type=jnp.float32) + b3_ref[...]

    # Residual + per-original-row L2 normalize, scaled by sqrt(size1).
    y = x1 + x5
    # Segmented sum of squares over each original size1-feature group via a
    # block-diagonal ones matmul (f32): every lane of a group receives that group's
    # sum of squares -> no in-kernel reshape, no cross-lane VPU reduction.
    ss = jnp.dot(y * y, ones_ref[...], preferred_element_type=jnp.float32)
    # F.normalize clamps the norm at eps=1e-12 -> clamp ss at eps^2, single rsqrt.
    inv = jax.lax.rsqrt(jnp.maximum(ss, 1e-24))
    o_ref[...] = (y * (inv * feat_scale)).astype(o_ref.dtype)


def channel_decoder(x, w1, b1, w2, b2, w3, b3, *,
                    block_rows=1024, matmul_dtype=jnp.float32,
                    out_dtype=jnp.float32, use_core_parallel=False):
    """x: [B, in]; w*: [in, out] (pre-transposed); b*: [1, out] or [out]."""
    B, fin = x.shape
    size1 = w1.shape[1]
    size2 = w2.shape[1]

    fold = _pick_fold(fin, size1, size2)
    fin_f, s1_f, s2_f = fold * fin, fold * size1, fold * size2
    feat_scale = float(math.sqrt(size1))

    # ---- block-diagonal (batch-folded) weights, tiled biases, ones matrix ----
    eye = jnp.eye(fold, dtype=jnp.float32)
    w1f = jnp.kron(eye, w1.astype(jnp.float32)).astype(matmul_dtype)
    w2f = jnp.kron(eye, w2.astype(jnp.float32)).astype(matmul_dtype)
    w3f = jnp.kron(eye, w3.astype(jnp.float32)).astype(matmul_dtype)
    b1f = jnp.tile(jnp.reshape(b1, (1, size1)).astype(jnp.float32), (1, fold))
    b2f = jnp.tile(jnp.reshape(b2, (1, size2)).astype(jnp.float32), (1, fold))
    b3f = jnp.tile(jnp.reshape(b3, (1, size1)).astype(jnp.float32), (1, fold))
    ones_bd = jnp.kron(eye, jnp.ones((size1, size1), dtype=jnp.float32))

    # ---- folded-row tiling of the batch ----
    r0 = -(-B // fold)                       # folded rows needed
    n_blocks = -(-r0 // block_rows)
    if n_blocks == 1:
        tr = r0                              # block == full dim -> no (8,128) rule
    else:
        tr = _round_up(-(-r0 // n_blocks), 8)
        n_blocks = -(-r0 // tr)
    r_pad = n_blocks * tr
    b_pad = r_pad * fold

    if b_pad != B:
        # TODO(synk): for very large badly-aligned B this pad is an extra HBM pass
        # over x; a kernel-side tail clamp would remove it.
        x = jnp.pad(x, ((0, b_pad - B), (0, 0)))
    xf = jnp.reshape(x, (r_pad, fin_f))      # free row-major reinterpretation

    x_spec = pl.BlockSpec((tr, fin_f), lambda i: (i, 0))
    out_spec = pl.BlockSpec((tr, s1_f), lambda i: (i, 0))
    const = lambda shape: pl.BlockSpec(shape, lambda i: (0, 0))   # VMEM-resident

    itemsize_in = x.dtype.itemsize
    itemsize_w = jnp.dtype(matmul_dtype).itemsize
    itemsize_out = jnp.dtype(out_dtype).itemsize
    w_bytes = itemsize_w * (fin_f * s1_f + s1_f * s2_f + s2_f * s1_f) + 4 * s1_f * s1_f
    flops = 2 * r_pad * (fin_f * s1_f + s1_f * s2_f + s2_f * s1_f + s1_f * s1_f)
    bytes_accessed = (b_pad * fin * itemsize_in + b_pad * size1 * itemsize_out
                      + w_bytes + 4 * (2 * s1_f + s2_f))
    cost = pl.CostEstimate(flops=flops, transcendentals=r_pad * s1_f,
                           bytes_accessed=bytes_accessed)

    # Per-step VMEM: double-buffered x/out blocks + weights + f32 intermediates.
    vmem_need = (2 * tr * fin_f * itemsize_in + 2 * tr * s1_f * itemsize_out
                 + 2 * w_bytes + 4 * tr * (5 * s1_f + 2 * s2_f))
    vmem_limit = min(48 * 1024 * 1024, max(32 * 1024 * 1024, int(1.25 * vmem_need)))

    # v7x: request explicit TensorCore sharding of the batch-tile axis.
    sem = pltpu.CORE_PARALLEL if use_core_parallel else "parallel"

    out = pl.pallas_call(
        functools.partial(channel_decoder_kernel,
                          matmul_dtype=matmul_dtype, feat_scale=feat_scale),
        out_shape=jax.ShapeDtypeStruct((r_pad, s1_f), out_dtype),
        grid=(n_blocks,),
        in_specs=[
            x_spec,
            const((fin_f, s1_f)), const((1, s1_f)),
            const((s1_f, s2_f)), const((1, s2_f)),
            const((s2_f, s1_f)), const((1, s1_f)),
            const((s1_f, s1_f)),
        ],
        out_specs=out_spec,
        compiler_params=pltpu.CompilerParams(
            dimension_semantics=(sem,),
            vmem_limit_bytes=vmem_limit),
        cost_estimate=cost,
    )(xf, w1f, b1f, w2f, b2f, w3f, b3f, ones_bd)

    out = jnp.reshape(out, (b_pad, size1))   # free row-major reinterpretation back
    return out[:B] if b_pad != B else out


def reference(x, w1, b1, w2, b2, w3, b3):
    x1 = x @ w1 + jnp.reshape(b1, (1, -1))
    x3 = jnp.maximum(x1, 0.0) @ w2 + jnp.reshape(b2, (1, -1))
    x5 = jnp.maximum(x3, 0.0) @ w3 + jnp.reshape(b3, (1, -1))
    y = x1 + x5
    n = jnp.maximum(jnp.sqrt(jnp.sum(y * y, axis=1, keepdims=True)), 1e-12)
    return (y / n) * math.sqrt(y.shape[1])


if __name__ == "__main__":
    # Small shapes consistent with the module: in_features=16, size1=32, size2=64.
    IN_FEATURES, SIZE1, SIZE2 = 16, 32, 64

    key = jax.random.PRNGKey(0)
    kx, k1, k2, k3, kb1, kb2, kb3 = jax.random.split(key, 7)

    # PyTorch Linear weight is [out, in]; we store the transpose [in, out].
    w1 = jax.random.normal(k1, (IN_FEATURES, SIZE1), jnp.float32) / math.sqrt(IN_FEATURES)
    b1 = jax.random.normal(kb1, (1, SIZE1), jnp.float32) * 0.01
    w2 = jax.random.normal(k2, (SIZE1, SIZE2), jnp.float32) / math.sqrt(SIZE1)
    b2 = jax.random.normal(kb2, (1, SIZE2), jnp.float32) * 0.01
    w3 = jax.random.normal(k3, (SIZE2, SIZE1), jnp.float32) / math.sqrt(SIZE2)
    b3 = jax.random.normal(kb3, (1, SIZE1), jnp.float32) * 0.01

    # Case 1: modest batch -> single grid step, lane-dense folded layout, f32.
    B = 8
    x = jax.random.normal(kx, (B, IN_FEATURES), jnp.float32)
    out = jax.block_until_ready(channel_decoder(x, w1, b1, w2, b2, w3, b3))
    ref = reference(x, w1, b1, w2, b2, w3, b3)
    assert out.shape == (B, SIZE1)
    assert jnp.allclose(out, ref, atol=1e-4, rtol=1e-4), "case1 f32 mismatch"

    # Case 2: batch not a multiple of the fold factor (tail padding), one grid step.
    B2 = 20
    x2 = jax.random.normal(jax.random.PRNGKey(1), (B2, IN_FEATURES), jnp.float32)
    out2 = jax.block_until_ready(channel_decoder(x2, w1, b1, w2, b2, w3, b3))
    ref2 = reference(x2, w1, b1, w2, b2, w3, b3)
    assert out2.shape == (B2, SIZE1)
    assert jnp.allclose(out2, ref2, atol=1e-4, rtol=1e-4), "case2 f32 mismatch"

    # Case 3: multi-step grid (block_rows=16 folded rows -> 3 pipelined steps).
    B3 = 300
    x3_ = jax.random.normal(jax.random.PRNGKey(2), (B3, IN_FEATURES), jnp.float32)
    out3 = jax.block_until_ready(
        channel_decoder(x3_, w1, b1, w2, b2, w3, b3, block_rows=16))
    ref3 = reference(x3_, w1, b1, w2, b2, w3, b3)
    assert out3.shape == (B3, SIZE1)
    assert jnp.allclose(out3, ref3, atol=1e-4, rtol=1e-4), "case3 tiled mismatch"

    # Case 4: bf16 MXU operands (v6e/v7x fast path); looser tolerance for bf16.
    out4 = jax.block_until_ready(
        channel_decoder(x3_, w1, b1, w2, b2, w3, b3, block_rows=16,
                        matmul_dtype=jnp.bfloat16))
    assert out4.shape == (B3, SIZE1)
    assert jnp.allclose(out4, ref3, atol=3e-2, rtol=3e-2), "case4 bf16 mismatch"

    print("KERNEL_OK")
</pallas_src>

<mosaic_0001>
module attributes {stable_mosaic.version = 11 : i64} {
  func.func @channel_decoder_kernel(%arg0: i32, %arg1: memref<1x128xf32, #tpu.memory_space<vmem>>, %arg2: memref<128x256xf32, #tpu.memory_space<vmem>>, %arg3: memref<1x256xf32, #tpu.memory_space<vmem>>, %arg4: memref<256x512xf32, #tpu.memory_space<vmem>>, %arg5: memref<1x512xf32, #tpu.memory_space<vmem>>, %arg6: memref<512x256xf32, #tpu.memory_space<vmem>>, %arg7: memref<1x256xf32, #tpu.memory_space<vmem>>, %arg8: memref<256x256xf32, #tpu.memory_space<vmem>>, %arg9: memref<1x256xf32, #tpu.memory_space<vmem>>) attributes {dimension_semantics = [#tpu.dimension_semantics<parallel>], iteration_bounds = array<i64: 1>, scalar_prefetch = 0 : i64, scratch_operands = 0 : i64, tpu.core_type = #tpu.core_type<tc>, window_params = [{transform_indices = @transform_0, window_bounds = array<i64: 1, 128>}, {pipeline_mode = #tpu.pipeline_mode<synchronous>, transform_indices = @transform_1, window_bounds = array<i64: 128, 256>}, {pipeline_mode = #tpu.pipeline_mode<synchronous>, transform_indices = @transform_2, window_bounds = array<i64: 1, 256>}, {pipeline_mode = #tpu.pipeline_mode<synchronous>, transform_indices = @transform_3, window_bounds = array<i64: 256, 512>}, {pipeline_mode = #tpu.pipeline_mode<synchronous>, transform_indices = @transform_4, window_bounds = array<i64: 1, 512>}, {pipeline_mode = #tpu.pipeline_mode<synchronous>, transform_indices = @transform_5, window_bounds = array<i64: 512, 256>}, {pipeline_mode = #tpu.pipeline_mode<synchronous>, transform_indices = @transform_6, window_bounds = array<i64: 1, 256>}, {pipeline_mode = #tpu.pipeline_mode<synchronous>, transform_indices = @transform_7, window_bounds = array<i64: 256, 256>}, {transform_indices = @transform_8, window_bounds = array<i64: 1, 256>}]} {
    %c0 = arith.constant 0 : index
    %c0_0 = arith.constant 0 : index
    %0 = vector.load %arg1[%c0, %c0_0] : memref<1x128xf32, #tpu.memory_space<vmem>>, vector<1x128xf32>
    %c0_1 = arith.constant 0 : index
    %c0_2 = arith.constant 0 : index
    %1 = vector.load %arg2[%c0_1, %c0_2] : memref<128x256xf32, #tpu.memory_space<vmem>>, vector<128x256xf32>
    %cst = arith.constant dense<0.000000e+00> : vector<1x256xf32>
    %2 = tpu.matmul %0, %1, %cst {dimension_numbers = #tpu.dot_dimension_numbers<[1], [0], [0], [1], [0, 0, 1, 1], [], []>} : vector<1x128xf32>, vector<128x256xf32>, vector<1x256xf32> -> vector<1x256xf32>
    %c0_3 = arith.constant 0 : index
    %c0_4 = arith.constant 0 : index
    %3 = vector.load %arg3[%c0_3, %c0_4] : memref<1x256xf32, #tpu.memory_space<vmem>>, vector<1x256xf32>
    %4 = arith.addf %2, %3 : vector<1x256xf32>
    %cst_5 = arith.constant 0.000000e+00 : f32
    %5 = vector.broadcast %cst_5 : f32 to vector<1x256xf32>
    %6 = arith.maximumf %4, %5 : vector<1x256xf32>
    %c0_6 = arith.constant 0 : index
    %c0_7 = arith.constant 0 : index
    %7 = vector.load %arg4[%c0_6, %c0_7] : memref<256x512xf32, #tpu.memory_space<vmem>>, vector<256x512xf32>
    %cst_8 = arith.constant dense<0.000000e+00> : vector<1x512xf32>
    %8 = tpu.matmul %6, %7, %cst_8 {dimension_numbers = #tpu.dot_dimension_numbers<[1], [0], [0], [1], [0, 0, 1, 1], [], []>} : vector<1x256xf32>, vector<256x512xf32>, vector<1x512xf32> -> vector<1x512xf32>
    %c0_9 = arith.constant 0 : index
    %c0_10 = arith.constant 0 : index
    %9 = vector.load %arg5[%c0_9, %c0_10] : memref<1x512xf32, #tpu.memory_space<vmem>>, vector<1x512xf32>
    %10 = arith.addf %8, %9 : vector<1x512xf32>
    %cst_11 = arith.constant 0.000000e+00 : f32
    %11 = vector.broadcast %cst_11 : f32 to vector<1x512xf32>
    %12 = arith.maximumf %10, %11 : vector<1x512xf32>
    %c0_12 = arith.constant 0 : index
    %c0_13 = arith.constant 0 : index
    %13 = vector.load %arg6[%c0_12, %c0_13] : memref<512x256xf32, #tpu.memory_space<vmem>>, vector<512x256xf32>
    %cst_14 = arith.constant dense<0.000000e+00> : vector<1x256xf32>
    %14 = tpu.matmul %12, %13, %cst_14 {dimension_numbers = #tpu.dot_dimension_numbers<[1], [0], [0], [1], [0, 0, 1, 1], [], []>} : vector<1x512xf32>, vector<512x256xf32>, vector<1x256xf32> -> vector<1x256xf32>
    %c0_15 = arith.constant 0 : index
    %c0_16 = arith.constant 0 : index
    %15 = vector.load %arg7[%c0_15, %c0_16] : memref<1x256xf32, #tpu.memory_space<vmem>>, vector<1x256xf32>
    %16 = arith.addf %14, %15 : vector<1x256xf32>
    %17 = arith.addf %4, %16 : vector<1x256xf32>
    %18 = arith.mulf %17, %17 : vector<1x256xf32>
    %c0_17 = arith.constant 0 : index
    %c0_18 = arith.constant 0 : index
    %19 = vector.load %arg8[%c0_17, %c0_18] : memref<256x256xf32, #tpu.memory_space<vmem>>, vector<256x256xf32>
    %cst_19 = arith.constant dense<0.000000e+00> : vector<1x256xf32>
    %20 = tpu.matmul %18, %19, %cst_19 {dimension_numbers = #tpu.dot_dimension_numbers<[1], [0], [0], [1], [0, 0, 1, 1], [], []>} : vector<1x256xf32>, vector<256x256xf32>, vector<1x256xf32> -> vector<1x256xf32>
    %cst_20 = arith.constant 1.000000e-24 : f32
    %21 = vector.broadcast %cst_20 : f32 to vector<1x256xf32>
    %22 = arith.maximumf %20, %21 : vector<1x256xf32>
    %23 = math.rsqrt %22 : vector<1x256xf32>
    %cst_21 = arith.constant 5.65685415 : f32
    %24 = vector.broadcast %cst_21 : f32 to vector<1x256xf32>
    %25 = arith.mulf %23, %24 : vector<1x256xf32>
    %26 = arith.mulf %17, %25 : vector<1x256xf32>
    %c0_22 = arith.constant 0 : index
    %c0_23 = arith.constant 0 : index
    %27 = vector.load %arg9[%c0_22, %c0_23] : memref<1x256xf32, #tpu.memory_space<vmem>>, vector<1x256xf32>
    tpu.vector_store %arg9[%c0_22, %c0_23], %26 {strides = array<i32>} : memref<1x256xf32, #tpu.memory_space<vmem>>, vector<1x256xf32>,
    return
  }
  func.func @transform_0(%arg0: i32) -> (i32, i32) {
    %c0_i32 = arith.constant 0 : i32
    %c0_i32_0 = arith.constant 0 : i32
    return %arg0, %c0_i32 : i32, i32
  }
  func.func @transform_1(%arg0: i32) -> (i32, i32) {
    %c0_i32 = arith.constant 0 : i32
    %c0_i32_0 = arith.constant 0 : i32
    %c0_i32_1 = arith.constant 0 : i32
    return %c0_i32, %c0_i32_0 : i32, i32
  }
  func.func @transform_2(%arg0: i32) -> (i32, i32) {
    %c0_i32 = arith.constant 0 : i32
    %c0_i32_0 = arith.constant 0 : i32
    %c0_i32_1 = arith.constant 0 : i32
    return %c0_i32, %c0_i32_0 : i32, i32
  }
  func.func @transform_3(%arg0: i32) -> (i32, i32) {
    %c0_i32 = arith.constant 0 : i32
    %c0_i32_0 = arith.constant 0 : i32
    %c0_i32_1 = arith.constant 0 : i32
    return %c0_i32, %c0_i32_0 : i32, i32
  }
  func.func @transform_4(%arg0: i32) -> (i32, i32) {
    %c0_i32 = arith.constant 0 : i32
    %c0_i32_0 = arith.constant 0 : i32
    %c0_i32_1 = arith.constant 0 : i32
    return %c0_i32, %c0_i32_0 : i32, i32
  }
  func.func @transform_5(%arg0: i32) -> (i32, i32) {
    %c0_i32 = arith.constant 0 : i32
    %c0_i32_0 = arith.constant 0 : i32
    %c0_i32_1 = arith.constant 0 : i32
    return %c0_i32, %c0_i32_0 : i32, i32
  }
  func.func @transform_6(%arg0: i32) -> (i32, i32) {
    %c0_i32 = arith.constant 0 : i32
    %c0_i32_0 = arith.constant 0 : i32
    %c0_i32_1 = arith.constant 0 : i32
    return %c0_i32, %c0_i32_0 : i32, i32
  }
  func.func @transform_7(%arg0: i32) -> (i32, i32) {
    %c0_i32 = arith.constant 0 : i32
    %c0_i32_0 = arith.constant 0 : i32
    %c0_i32_1 = arith.constant 0 : i32
    return %c0_i32, %c0_i32_0 : i32, i32
  }
  func.func @transform_8(%arg0: i32) -> (i32, i32) {
    %c0_i32 = arith.constant 0 : i32
    %c0_i32_0 = arith.constant 0 : i32
    return %arg0, %c0_i32 : i32, i32
  }
}

</mosaic_0001>

<bundles_post_ra>
// kernel: tpu_custom_call.1
= control target key start
LH: loop header
LB: loop body
LE: loop exit
PB: predicated region body
PF: predicated region fallthrough
CT: control target
= control target key end

     0   :  { %13 = vsyncpa [#allocation3], 0  ;;  %s1243_s0 = inlined_call_operand.hbm [shape: f32[1,128], index: 0, kind: input, shape index: {}]   ;;  %s1244_s1 = inlined_call_operand.hbm [shape: f32[128,256], index: 1, kind: input, shape index: {}]   ;;  %s1245_s2 = inlined_call_operand.vmem [shape: f32[1,256], index: 2, kind: input, shape index: {}]   ;;  %s1246_s3 = inlined_call_operand.hbm [shape: f32[256,512], index: 3, kind: input, shape index: {}]   ;;  %s1247_s4 = inlined_call_operand.vmem [shape: f32[1,512], index: 4, kind: input, shape index: {}]   ;;  %s1248_s5 = inlined_call_operand.hbm [shape: f32[512,256], index: 5, kind: input, shape index: {}]   ;;  %s1249_s6 = inlined_call_operand.vmem [shape: f32[1,256], index: 6, kind: input, shape index: {}]   ;;  %s1250_s7 = inlined_call_operand.hbm [shape: f32[256,256], index: 7, kind: input, shape index: {}]   ;;  %s1251_s8 = inlined_call_operand.hbm [shape: f32[1,256], index: 8, kind: output, shape index: {}]  }
   0x1   :  { %14 = vsyncpa [#allocation6], 0 }
   0x2   :  { %15 = vsyncpa [#allocation9], 0 }
   0x3   :  { %16 = vsyncpa [#allocation4], 0  ;;  %s1123_s27 = smov [#allocation5]  }
   0x4   :  { %s32_s28 = sshll.u32 %s1123_s27, 4  ;;  %s33_s28 = int_to_ptr.vmem [resolvable:$true] %s32_s28 }
   0x5   :  { %s1003_s29 = scalar_lea.vmem %s33_s28, 4096  ;;  %p1008_p1 = scmp.lt.s32.totalorder %s33_s28, %s33_s28 }
   0x6   :  { %p1004_p0 = scmp.ne.s32.totalorder %s33_s28, %s1003_s29  ;;  %p1009_p2 = scmp.lt.s32.totalorder %s1003_s29, %s1003_s29 }
   0x8   :  { %p1010_p3 = por %p1009_p2, %p1008_p1 }
   0xa   :  { %p1011_p4 = pnand %p1010_p3, %p1004_p0 }
   0xc   :  { %1014 = shalt.err (!%p1011_p4)
}
   0xd   :  { %s1124_s30 = smov 256   ;;  %s1125_s9 = smov 16  }
   0xe   :  { %38 = dma.hbm_to_vmem [thread:$0]  %s1244_s1, 4096, %s33_s28, [#allocation6], %s1124_s30, %s1124_s30, %s1125_s9  }
   0xf   :  { %s1126_s12 = smov [#allocation8]   ;;  %s1127_s14 = smov [#allocation2]  }
  0x10   :  { %s60_s13 = sshll.u32 %s1126_s12, 4  ;;  %s23_s15 = sshll.u32 %s1127_s14, 4  ;;  %s61_s13 = int_to_ptr.vmem [resolvable:$true] %s60_s13  ;;  %s24_s15 = int_to_ptr.vmem [resolvable:$true] %s23_s15 }
  0x11   :  { %s1023_s16 = scalar_lea.vmem %s61_s13, 16384  ;;  %p1028_p6 = scmp.lt.s32.totalorder %s61_s13, %s61_s13 }
  0x12   :  { %p1024_p5 = scmp.ne.s32.totalorder %s61_s13, %s1023_s16  ;;  %p1029_p7 = scmp.lt.s32.totalorder %s1023_s16, %s1023_s16 }
  0x14   :  { %p1030_p8 = por %p1029_p7, %p1028_p6 }
  0x16   :  { %p1031_p9 = pnand %p1030_p8, %p1024_p5 }
  0x18   :  { %1034 = shalt.err (!%p1031_p9)
}
  0x19   :  { %66 = dma.hbm_to_vmem [thread:$0]  %s1248_s5, 16384, %s61_s13, [#allocation9], %s1124_s30, %s1124_s30, %s1125_s9  }
  0x1a   :  { %s1043_s1 = scalar_lea.vmem %s24_s15, 16  ;;  %s1047_s19 = scalar_lea.vmem %s24_s15, 32 }
  0x1b   :  { %p1044_p10 = scmp.ne.s32.totalorder %s24_s15, %s1043_s1  ;;  %p1048_p11 = scmp.lt.s32.totalorder %s24_s15, %s24_s15 }
  0x1c   :  { %p1049_p12 = scmp.lt.s32.totalorder %s1047_s19, %s1043_s1 }
  0x1e   :  { %p1050_p13 = por %p1049_p12, %p1048_p11 }
  0x20   :  { %p1051_p0 = pnand %p1050_p13, %p1044_p10 }
  0x22   :  { %1054 = shalt.err (!%p1051_p0)
}
  0x23   :  { %26 = dma.hbm_to_vmem [thread:$0]  %s1243_s0, 16, %s24_s15, [#allocation3]  }
  0x24   :  { %s1128_s22 = smov [#allocation7]  }
  0x25   :  { %s46_s23 = sshll.u32 %s1128_s22, 4  ;;  %s47_s23 = int_to_ptr.vmem [resolvable:$true] %s46_s23 }
  0x26   :  { %s1063_s24 = scalar_lea.vmem %s47_s23, 16384  ;;  %p1068_p2 = scmp.lt.s32.totalorder %s47_s23, %s47_s23 }
  0x27   :  { %p1064_p1 = scmp.ne.s32.totalorder %s47_s23, %s1063_s24  ;;  %p1069_p3 = scmp.lt.s32.totalorder %s1063_s24, %s1063_s24 }
  0x29   :  { %p1070_p4 = por %p1069_p3, %p1068_p2 }
  0x2b   :  { %p1071_p5 = pnand %p1070_p4, %p1064_p1 }
  0x2d   :  { %1074 = shalt.err (!%p1071_p5)
}
  0x2e   :  { %s1129_s5 = smov 512   ;;  %s1130_s25 = smov 32  }
  0x2f   :  { %52 = dma.hbm_to_vmem [thread:$0]  %s1246_s3, 16384, %s47_s23, [#allocation6], %s1129_s5, %s1129_s5, %s1130_s25  }
  0x30   :  { %s1131_s28 = smov [#allocation10]  }
  0x31   :  { %s74_s29 = sshll.u32 %s1131_s28, 4  ;;  %s75_s29 = int_to_ptr.vmem [resolvable:$true] %s74_s29 }
  0x32   :  { %s1083_s0 = scalar_lea.vmem %s75_s29, 8192  ;;  %p1088_p7 = scmp.lt.s32.totalorder %s75_s29, %s75_s29 }
  0x33   :  { %p1084_p6 = scmp.ne.s32.totalorder %s75_s29, %s1083_s0  ;;  %p1089_p8 = scmp.lt.s32.totalorder %s1083_s0, %s1083_s0 }
  0x35   :  { %p1090_p9 = por %p1089_p8, %p1088_p7 }
  0x37   :  { %p1091_p10 = pnand %p1090_p9, %p1084_p6 }
  0x39   :  { %1094 = shalt.err (!%p1091_p10)
}
  0x3a   :  { %80 = dma.hbm_to_vmem [thread:$0]  %s1250_s7, 8192, %s75_s29, [#allocation9], %s1124_s30, %s1124_s30, %s1125_s9  }
  0x3b   :  { %1115 = dma.done.wait [#allocation3], 16  }
  0x3c   :  { %1116 = vsyncadd [#allocation3], 4294967280 }
  0x3d   :  { %1117 = dma.done.wait [#allocation6], 20480  }
  0x3e   :  { %1118 = vsyncadd [#allocation6], 4294946816 }
  0x3f   :  { %1119 = dma.done.wait [#allocation9], 24576  }
  0x40   :  { %1120 = vsyncadd [#allocation9], 4294942720  ;;  %v1132_v0 = vmov 0.0   ;;  %v128_v1 = vld [vmem:[#allocation5 + $0xf8] sm:$0xff]  ;;  %v127_v2 = vld [vmem:[#allocation5 + $0xf0] sm:$0xff] }
  0x41   :  { %205 = vmatprep.mubr.f32.mxu0 %v1132_v0  ;;  %v126_v3 = vld [vmem:[#allocation5 + $0xe8] sm:$0xff]  ;;  %141 = vmatprep.subr.mxu0 %v128_v1  ;;  %v125_v4 = vld [vmem:[#allocation5 + $0xe0] sm:$0xff]  ;;  %v124_v5 = vld [vmem:[#allocation5 + $0xd8] sm:$0xff] }
  0x42   :  { %142 = vmatpush1.msra.mxu0 %v127_v2  ;;  %v123_v6 = vld [vmem:[#allocation5 + $0xd0] sm:$0xff]  ;;  %v122_v7 = vld [vmem:[#allocation5 + $0xc8] sm:$0xff]  ;;  %v121_v8 = vld [vmem:[#allocation5 + $0xc0] sm:$0xff] }
  0x43   :  { %143 = vmatprep.subr.mxu0 %v126_v3  ;;  %v120_v9 = vld [vmem:[#allocation5 + $0xb8] sm:$0xff]  ;;  %v119_v10 = vld [vmem:[#allocation5 + $0xb0] sm:$0xff]  ;;  %v118_v11 = vld [vmem:[#allocation5 + $0xa8] sm:$0xff] }
  0x44   :  { %144 = vmatpush1.msra.mxu0 %v125_v4  ;;  %v117_v12 = vld [vmem:[#allocation5 + $0xa0] sm:$0xff]  ;;  %v116_v13 = vld [vmem:[#allocation5 + $0x98] sm:$0xff]  ;;  %v115_v14 = vld [vmem:[#allocation5 + $0x90] sm:$0xff] }
  0x45   :  { %145 = vmatprep.subr.mxu0 %v124_v5  ;;  %v275_v15 = vld [vmem:[#allocation7 + $0x1e8] sm:$0xff]  ;;  %v274_v16 = vld [vmem:[#allocation7 + $0x1e0] sm:$0xff]  ;;  %v112_v22 = vld [vmem:[#allocation5 + $0x78] sm:$0xff] }
  0x46   :  { %146 = vmatpush1.msra.mxu0 %v123_v6  ;;  %v114_v17 = vld [vmem:[#allocation5 + $0x88] sm:$0xff]  ;;  %364 = vmatprep.subr.mxu1 %v275_v15  ;;  %v113_v19 = vld [vmem:[#allocation5 + $0x80] sm:$0xff]  ;;  %v111_v24 = vld [vmem:[#allocation5 + $0x70] sm:$0xff] }
  0x47   :  { %147 = vmatprep.subr.mxu0 %v122_v7  ;;  %v271_v18 = vld [vmem:[#allocation7 + $0x1c8] sm:$0xff]  ;;  %365 = vmatpush1.msra.mxu1 %v274_v16  ;;  %v270_v20 = vld [vmem:[#allocation7 + $0x1c0] sm:$0xff]  ;;  %v108_v30 = vld [vmem:[#allocation5 + $0x58] sm:$0xff] }
  0x48   :  { %148 = vmatpush1.msra.mxu0 %v121_v8  ;;  %v267_v21 = vld [vmem:[#allocation7 + $0x1a8] sm:$0xff]  ;;  %366 = vmatprep.subr.mxu1 %v271_v18  ;;  %v266_v23 = vld [vmem:[#allocation7 + $0x1a0] sm:$0xff]  ;;  %v107_v32 = vld [vmem:[#allocation5 + $0x50] sm:$0xff] }
  0x49   :  { %149 = vmatprep.subr.mxu0 %v120_v9  ;;  %367 = vmatpush1.msra.mxu1 %v270_v20  ;;  %v263_v25 = vld [vmem:[#allocation7 + $0x188] sm:$0xff]  ;;  %v262_v27 = vld [vmem:[#allocation7 + $0x180] sm:$0xff]  ;;  %v104_v38 = vld [vmem:[#allocation5 + $0x38] sm:$0xff] }
  0x4a   :  { %150 = vmatpush1.msra.mxu0 %v119_v10  ;;  %v110_v26 = vld [vmem:[#allocation5 + $0x68] sm:$0xff]  ;;  %368 = vmatprep.subr.mxu1 %v267_v21  ;;  %v109_v28 = vld [vmem:[#allocation5 + $0x60] sm:$0xff]  ;;  %v103_v40 = vld [vmem:[#allocation5 + $0x30] sm:$0xff] }
  0x4b   :  { %151 = vmatprep.subr.mxu0 %v118_v11  ;;  %369 = vmatpush1.msra.mxu1 %v266_v23  ;;  %v259_v29 = vld [vmem:[#allocation7 + $0x168] sm:$0xff]  ;;  %v258_v31 = vld [vmem:[#allocation7 + $0x160] sm:$0xff]  ;;  %v100_v46 = vld [vmem:[#allocation5 + $0x18] sm:$0xff] }
  0x4c   :  { %152 = vmatpush1.msra.mxu0 %v117_v12  ;;  %370 = vmatprep.subr.mxu1 %v263_v25  ;;  %v255_v33 = vld [vmem:[#allocation7 + $0x148] sm:$0xff]  ;;  %v254_v35 = vld [vmem:[#allocation7 + $0x140] sm:$0xff]  ;;  %v99_v48 = vld [vmem:[#allocation5 + $0x10] sm:$0xff] }
  0x4d   :  { %153 = vmatprep.subr.mxu0 %v116_v13  ;;  %371 = vmatpush1.msra.mxu1 %v262_v27  ;;  %v106_v34 = vld [vmem:[#allocation5 + $0x48] sm:$0xff]  ;;  %v105_v36 = vld [vmem:[#allocation5 + $0x40] sm:$0xff]  ;;  %v96_v54 = vld [vmem:[#allocation2] sm:$0x1] }
  0x4e   :  { %154 = vmatpush1.msra.mxu0 %v115_v14  ;;  %372 = vmatprep.subr.mxu1 %v259_v29  ;;  %v251_v37 = vld [vmem:[#allocation7 + $0x128] sm:$0xff]  ;;  %v250_v39 = vld [vmem:[#allocation7 + $0x120] sm:$0xff]  ;;  %v277_v55 = vld [vmem:[#allocation7 + $0x1f8] sm:$0xff] }
  0x4f   :  { %155 = vmatprep.subr.mxu0 %v114_v17  ;;  %373 = vmatpush1.msra.mxu1 %v258_v31  ;;  %v247_v41 = vld [vmem:[#allocation7 + $0x108] sm:$0xff]  ;;  %v246_v43 = vld [vmem:[#allocation7 + $0x100] sm:$0xff]  ;;  %v276_v56 = vld [vmem:[#allocation7 + $0x1f0] sm:$0xff] }
  0x50   :  { %156 = vmatpush1.msra.mxu0 %v113_v19  ;;  %374 = vmatprep.subr.mxu1 %v255_v33  ;;  %v102_v42 = vld [vmem:[#allocation5 + $0x28] sm:$0xff]  ;;  %v101_v44 = vld [vmem:[#allocation5 + $0x20] sm:$0xff]  ;;  %v273_v58 = vld [vmem:[#allocation7 + $0x1d8] sm:$0xff] }
  0x51   :  { %157 = vmatprep.subr.mxu0 %v112_v22  ;;  %375 = vmatpush1.msra.mxu1 %v254_v35  ;;  %v243_v45 = vld [vmem:[#allocation7 + $0xe8] sm:$0xff]  ;;  %v242_v47 = vld [vmem:[#allocation7 + $0xe0] sm:$0xff]  ;;  %v272_v60 = vld [vmem:[#allocation7 + $0x1d0] sm:$0xff] }
  0x52   :  { %158 = vmatpush1.msra.mxu0 %v111_v24  ;;  %376 = vmatprep.subr.mxu1 %v251_v37  ;;  %v239_v49 = vld [vmem:[#allocation7 + $0xc8] sm:$0xff]  ;;  %v238_v51 = vld [vmem:[#allocation7 + $0xc0] sm:$0xff]  ;;  %v269_v62 = vld [vmem:[#allocation7 + $0x1b8] sm:$0xff] }
  0x53   :  { %159 = vmatprep.subr.mxu0 %v110_v26  ;;  %377 = vmatpush1.msra.mxu1 %v250_v39  ;;  %v98_v50 = vld [vmem:[#allocation5 + $0x8] sm:$0xff]  ;;  %v97_v52 = vld [vmem:[#allocation5] sm:$0xff]  ;;  %v268_v0 = vld [vmem:[#allocation7 + $0x1b0] sm:$0xff] }
  0x54   :  { %160 = vmatpush1.msra.mxu0 %v109_v28  ;;  %378 = vmatprep.subr.mxu1 %v247_v41  ;;  %v235_v53 = vld [vmem:[#allocation7 + $0xa8] sm:$0xff]  ;;  %v234_v57 = vld [vmem:[#allocation7 + $0xa0] sm:$0xff]  ;;  %v265_v2 = vld [vmem:[#allocation7 + $0x198] sm:$0xff] }
  0x55   :  { %161 = vmatprep.subr.mxu0 %v108_v30  ;;  %379 = vmatpush1.msra.mxu1 %v246_v43  ;;  %v231_v59 = vld [vmem:[#allocation7 + $0x88] sm:$0xff]  ;;  %v230_v61 = vld [vmem:[#allocation7 + $0x80] sm:$0xff]  ;;  %v264_v4 = vld [vmem:[#allocation7 + $0x190] sm:$0xff] }
  0x56   :  { %162 = vmatpush1.msra.mxu0 %v107_v32  ;;  %380 = vmatprep.subr.mxu1 %v243_v45  ;;  %v227_v63 = vld [vmem:[#allocation7 + $0x68] sm:$0xff]  ;;  %v226_v1 = vld [vmem:[#allocation7 + $0x60] sm:$0xff]  ;;  %v261_v6 = vld [vmem:[#allocation7 + $0x178] sm:$0xff] }
  0x57   :  { %163 = vmatprep.subr.mxu0 %v106_v34  ;;  %381 = vmatpush1.msra.mxu1 %v242_v47  ;;  %v223_v3 = vld [vmem:[#allocation7 + $0x48] sm:$0xff]  ;;  %v222_v5 = vld [vmem:[#allocation7 + $0x40] sm:$0xff]  ;;  %v260_v8 = vld [vmem:[#allocation7 + $0x170] sm:$0xff] }
  0x58   :  { %164 = vmatpush1.msra.mxu0 %v105_v36  ;;  %382 = vmatprep.subr.mxu1 %v239_v49  ;;  %v219_v7 = vld [vmem:[#allocation7 + $0x28] sm:$0xff]  ;;  %v218_v9 = vld [vmem:[#allocation7 + $0x20] sm:$0xff]  ;;  %v257_v10 = vld [vmem:[#allocation7 + $0x158] sm:$0xff] }
  0x59   :  { %165 = vmatprep.subr.mxu0 %v104_v38  ;;  %383 = vmatpush1.msra.mxu1 %v238_v51  ;;  %v215_v11 = vld [vmem:[#allocation7 + $0x8] sm:$0xff]  ;;  %v256_v12 = vld [vmem:[#allocation7 + $0x150] sm:$0xff]  ;;  %v214_v13 = vld [vmem:[#allocation7] sm:$0xff] }
  0x5a   :  { %166 = vmatpush1.msra.mxu0 %v103_v40  ;;  %384 = vmatprep.subr.mxu1 %v235_v53  ;;  %v253_v14 = vld [vmem:[#allocation7 + $0x138] sm:$0xff]  ;;  %v339_v15 = vld [vmem:[#allocation7 + $0x3e8] sm:$0xff]  ;;  %v252_v16 = vld [vmem:[#allocation7 + $0x130] sm:$0xff] }
  0x5b   :  { %167 = vmatprep.subr.mxu0 %v102_v42  ;;  %385 = vmatpush1.msra.mxu1 %v234_v57  ;;  %v338_v17 = vld [vmem:[#allocation7 + $0x3e0] sm:$0xff]  ;;  %v249_v18 = vld [vmem:[#allocation7 + $0x118] sm:$0xff]  ;;  %v335_v19 = vld [vmem:[#allocation7 + $0x3c8] sm:$0xff] }
  0x5c   :  { %168 = vmatpush1.msra.mxu0 %v101_v44  ;;  %386 = vmatprep.subr.mxu1 %v231_v59  ;;  %v248_v20 = vld [vmem:[#allocation7 + $0x110] sm:$0xff]  ;;  %v334_v21 = vld [vmem:[#allocation7 + $0x3c0] sm:$0xff]  ;;  %v245_v22 = vld [vmem:[#allocation7 + $0xf8] sm:$0xff] }
  0x5d   :  { %169 = vmatprep.subr.mxu0 %v100_v46  ;;  %387 = vmatpush1.msra.mxu1 %v230_v61  ;;  %v331_v23 = vld [vmem:[#allocation7 + $0x3a8] sm:$0xff]  ;;  %v244_v24 = vld [vmem:[#allocation7 + $0xf0] sm:$0xff]  ;;  %v330_v25 = vld [vmem:[#allocation7 + $0x3a0] sm:$0xff] }
  0x5e   :  { %170 = vmatpush1.msra.mxu0 %v99_v48  ;;  %388 = vmatprep.subr.mxu1 %v227_v63  ;;  %v241_v26 = vld [vmem:[#allocation7 + $0xd8] sm:$0xff]  ;;  %v327_v27 = vld [vmem:[#allocation7 + $0x388] sm:$0xff]  ;;  %v240_v28 = vld [vmem:[#allocation7 + $0xd0] sm:$0xff] }
  0x5f   :  { %171 = vmatprep.subr.mxu0 %v98_v50  ;;  %389 = vmatpush1.msra.mxu1 %v226_v1  ;;  %v326_v29 = vld [vmem:[#allocation7 + $0x380] sm:$0xff]  ;;  %v237_v30 = vld [vmem:[#allocation7 + $0xb8] sm:$0xff]  ;;  %v323_v31 = vld [vmem:[#allocation7 + $0x368] sm:$0xff] }
  0x60   :  { %172 = vmatpush1.msra.mxu0 %v97_v52  ;;  %390 = vmatprep.subr.mxu1 %v223_v3  ;;  %v236_v32 = vld [vmem:[#allocation7 + $0xb0] sm:$0xff]  ;;  %v322_v33 = vld [vmem:[#allocation7 + $0x360] sm:$0xff]  ;;  %v233_v34 = vld [vmem:[#allocation7 + $0x98] sm:$0xff] }
  0x61   :  { %206 = vmatmul.mubr.f32.vlgmr.msra.gmra.mxu0 %v96_v54  ;;  %435 = vmatprep.subr.mxu0 %v277_v55  ;;  %v319_v35 = vld [vmem:[#allocation7 + $0x348] sm:$0xff]  ;;  %v232_v36 = vld [vmem:[#allocation7 + $0x90] sm:$0xff]  ;;  %v318_v37 = vld [vmem:[#allocation7 + $0x340] sm:$0xff] }
  0x62   :  { %436 = vmatpush1.msra.mxu0 %v276_v56  ;;  %391 = vmatpush1.msra.mxu1 %v222_v5  ;;  %v229_v38 = vld [vmem:[#allocation7 + $0x78] sm:$0xff]  ;;  %v315_v39 = vld [vmem:[#allocation7 + $0x328] sm:$0xff]  ;;  %v228_v40 = vld [vmem:[#allocation7 + $0x70] sm:$0xff] }
  0x63   :  { %437 = vmatprep.subr.mxu0 %v273_v58  ;;  %392 = vmatprep.subr.mxu1 %v219_v7  ;;  %v314_v41 = vld [vmem:[#allocation7 + $0x320] sm:$0xff]  ;;  %v225_v42 = vld [vmem:[#allocation7 + $0x58] sm:$0xff]  ;;  %v311_v43 = vld [vmem:[#allocation7 + $0x308] sm:$0xff] }
  0x64   :  { %438 = vmatpush1.msra.mxu0 %v272_v60  ;;  %393 = vmatpush1.msra.mxu1 %v218_v9  ;;  %v224_v44 = vld [vmem:[#allocation7 + $0x50] sm:$0xff]  ;;  %v310_v45 = vld [vmem:[#allocation7 + $0x300] sm:$0xff]  ;;  %v221_v46 = vld [vmem:[#allocation7 + $0x38] sm:$0xff] }
  0x65   :  { %439 = vmatprep.subr.mxu0 %v269_v62  ;;  %394 = vmatprep.subr.mxu1 %v215_v11  ;;  %v307_v47 = vld [vmem:[#allocation7 + $0x2e8] sm:$0xff]  ;;  %v220_v48 = vld [vmem:[#allocation7 + $0x30] sm:$0xff]  ;;  %v306_v49 = vld [vmem:[#allocation7 + $0x2e0] sm:$0xff] }
  0x66   :  { %440 = vmatpush1.msra.mxu0 %v268_v0  ;;  %395 = vmatpush1.msra.mxu1 %v214_v13  ;;  %v217_v50 = vld [vmem:[#allocation7 + $0x18] sm:$0xff]  ;;  %v303_v51 = vld [vmem:[#allocation7 + $0x2c8] sm:$0xff]  ;;  %v216_v52 = vld [vmem:[#allocation7 + $0x10] sm:$0xff] }
  0x67   :  { %441 = vmatprep.subr.mxu0 %v265_v2  ;;  %396 = vmatprep.subr.mxu1 %v339_v15  ;;  %v302_v53 = vld [vmem:[#allocation7 + $0x2c0] sm:$0xff]  ;;  %v341_v54 = vld [vmem:[#allocation7 + $0x3f8] sm:$0xff]  ;;  %v299_v55 = vld [vmem:[#allocation7 + $0x2a8] sm:$0xff] }
  0x68   :  { %442 = vmatpush1.msra.mxu0 %v264_v4  ;;  %397 = vmatpush2.msra.mxu1 %v338_v17  ;;  %v340_v56 = vld [vmem:[#allocation7 + $0x3f0] sm:$0xff]  ;;  %v298_v57 = vld [vmem:[#allocation7 + $0x2a0] sm:$0xff]  ;;  %v337_v58 = vld [vmem:[#allocation7 + $0x3d8] sm:$0xff] }
  0x69   :  { %443 = vmatprep.subr.mxu0 %v261_v6  ;;  %398 = vmatprep.subr.mxu1 %v335_v19  ;;  %v295_v59 = vld [vmem:[#allocation7 + $0x288] sm:$0xff]  ;;  %v336_v60 = vld [vmem:[#allocation7 + $0x3d0] sm:$0xff]  ;;  %v294_v61 = vld [vmem:[#allocation7 + $0x280] sm:$0xff] }
  0x6a   :  { %444 = vmatpush1.msra.mxu0 %v260_v8  ;;  %399 = vmatpush2.msra.mxu1 %v334_v21  ;;  %v333_v62 = vld [vmem:[#allocation7 + $0x3b8] sm:$0xff]  ;;  %v332_v63 = vld [vmem:[#allocation7 + $0x3b0] sm:$0xff] }
  0x6b   :  { %445 = vmatprep.subr.mxu0 %v257_v10  ;;  %400 = vmatprep.subr.mxu1 %v331_v23  ;;  %v329_v0 = vld [vmem:[#allocation7 + $0x398] sm:$0xff]  ;;  %v328_v1 = vld [vmem:[#allocation7 + $0x390] sm:$0xff] }
  0x6c   :  { %446 = vmatpush1.msra.mxu0 %v256_v12  ;;  %401 = vmatpush2.msra.mxu1 %v330_v25  ;;  %v325_v2 = vld [vmem:[#allocation7 + $0x378] sm:$0xff]  ;;  %v324_v3 = vld [vmem:[#allocation7 + $0x370] sm:$0xff] }
  0x6d   :  { %447 = vmatprep.subr.mxu0 %v253_v14  ;;  %402 = vmatprep.subr.mxu1 %v327_v27  ;;  %v321_v4 = vld [vmem:[#allocation7 + $0x358] sm:$0xff]  ;;  %v320_v5 = vld [vmem:[#allocation7 + $0x350] sm:$0xff] }
  0x6e   :  { %448 = vmatpush1.msra.mxu0 %v252_v16  ;;  %403 = vmatpush2.msra.mxu1 %v326_v29  ;;  %v317_v6 = vld [vmem:[#allocation7 + $0x338] sm:$0xff]  ;;  %v316_v7 = vld [vmem:[#allocation7 + $0x330] sm:$0xff] }
  0x6f   :  { %449 = vmatprep.subr.mxu0 %v249_v18  ;;  %404 = vmatprep.subr.mxu1 %v323_v31  ;;  %v313_v8 = vld [vmem:[#allocation7 + $0x318] sm:$0xff]  ;;  %v312_v9 = vld [vmem:[#allocation7 + $0x310] sm:$0xff]  ;;  %v291_v18 = vld [vmem:[#allocation7 + $0x268] sm:$0xff] }
  0x70   :  { %450 = vmatpush1.msra.mxu0 %v248_v20  ;;  %405 = vmatpush2.msra.mxu1 %v322_v33  ;;  %v309_v10 = vld [vmem:[#allocation7 + $0x2f8] sm:$0xff]  ;;  %v308_v11 = vld [vmem:[#allocation7 + $0x2f0] sm:$0xff]  ;;  %v290_v20 = vld [vmem:[#allocation7 + $0x260] sm:$0xff] }
  0x71   :  { %451 = vmatprep.subr.mxu0 %v245_v22  ;;  %406 = vmatprep.subr.mxu1 %v319_v35  ;;  %v305_v12 = vld [vmem:[#allocation7 + $0x2d8] sm:$0xff]  ;;  %v304_v13 = vld [vmem:[#allocation7 + $0x2d0] sm:$0xff]  ;;  %v287_v22 = vld [vmem:[#allocation7 + $0x248] sm:$0xff] }
  0x72   :  { %452 = vmatpush1.msra.mxu0 %v244_v24  ;;  %407 = vmatpush2.msra.mxu1 %v318_v37  ;;  %v301_v14 = vld [vmem:[#allocation7 + $0x2b8] sm:$0xff]  ;;  %v300_v15 = vld [vmem:[#allocation7 + $0x2b0] sm:$0xff]  ;;  %v286_v24 = vld [vmem:[#allocation7 + $0x240] sm:$0xff] }
  0x73   :  { %453 = vmatprep.subr.mxu0 %v241_v26  ;;  %408 = vmatprep.subr.mxu1 %v315_v39  ;;  %v297_v16 = vld [vmem:[#allocation7 + $0x298] sm:$0xff]  ;;  %v296_v17 = vld [vmem:[#allocation7 + $0x290] sm:$0xff]  ;;  %v283_v26 = vld [vmem:[#allocation7 + $0x228] sm:$0xff] }
  0x74   :  { %454 = vmatpush1.msra.mxu0 %v240_v28  ;;  %409 = vmatpush2.msra.mxu1 %v314_v41  ;;  %v293_v19 = vld [vmem:[#allocation7 + $0x278] sm:$0xff]  ;;  %v292_v21 = vld [vmem:[#allocation7 + $0x270] sm:$0xff]  ;;  %v282_v28 = vld [vmem:[#allocation7 + $0x220] sm:$0xff] }
  0x75   :  { %455 = vmatprep.subr.mxu0 %v237_v30  ;;  %410 = vmatprep.subr.mxu1 %v311_v43  ;;  %v289_v23 = vld [vmem:[#allocation7 + $0x258] sm:$0xff]  ;;  %v288_v25 = vld [vmem:[#allocation7 + $0x250] sm:$0xff]  ;;  %v279_v30 = vld [vmem:[#allocation7 + $0x208] sm:$0xff] }
  0x76   :  { %456 = vmatpush1.msra.mxu0 %v236_v32  ;;  %411 = vmatpush2.msra.mxu1 %v310_v45  ;;  %v285_v27 = vld [vmem:[#allocation7 + $0x238] sm:$0xff]  ;;  %v284_v29 = vld [vmem:[#allocation7 + $0x230] sm:$0xff]  ;;  %v278_v32 = vld [vmem:[#allocation7 + $0x200] sm:$0xff] }
  0x77   :  { %457 = vmatprep.subr.mxu0 %v233_v34  ;;  %412 = vmatprep.subr.mxu1 %v307_v47  ;;  %v281_v31 = vld [vmem:[#allocation7 + $0x218] sm:$0xff]  ;;  %v280_v33 = vld [vmem:[#allocation7 + $0x210] sm:$0xff] }
  0x78   :  { %458 = vmatpush1.msra.mxu0 %v232_v36  ;;  %413 = vmatpush2.msra.mxu1 %v306_v49  ;;  %v541_v34 = vld [vmem:[#allocation8 + $0xf8] sm:$0xff]  ;;  %v131_v36 = vlaneseq  ;;  %v129_v39 = vld [vmem:[%s1245_s2] sm:$0x3] }
  0x79   :  { %459 = vmatprep.subr.mxu0 %v229_v38  ;;  %414 = vmatprep.subr.mxu1 %v303_v51  ;;  %v605_v35 = vld [vmem:[#allocation8 + $0x2f8] sm:$0xff]  ;;  %v540_v49 = vld [vmem:[#allocation8 + $0xf0] sm:$0xff]  ;;  %v539_v51 = vld [vmem:[#allocation8 + $0xe8] sm:$0xff] }
  0x7a   :  { %460 = vmatpush1.msra.mxu0 %v228_v40  ;;  %415 = vmatpush2.msra.mxu1 %v302_v53  ;;  %v1205_v37 = vshrl.u32 %v131_v36, 7  ;;  %v538_v53 = vld [vmem:[#allocation8 + $0xe0] sm:$0xff]  ;;  %vm959_vm0 = vcmp.lt.s32.totalorder %v131_v36, 256 }
  0x7b   :  { %461 = vmatprep.subr.mxu0 %v225_v42  ;;  %416 = vmatprep.subr.mxu1 %v299_v55  ;;  %v537_v55 = vld [vmem:[#allocation8 + $0xd8] sm:$0xff] }
  0x7c   :  { %462 = vmatpush1.msra.mxu0 %v224_v44  ;;  %417 = vmatpush2.msra.mxu1 %v298_v57  ;;  %v1208_v38 = vsub.s32 0, %v1205_v37  ;;  %v1214_v40 = vsub.s32 1, %v1205_v37  ;;  %v536_v57 = vld [vmem:[#allocation8 + $0xd0] sm:$0xff] }
  0x7d   :  { %463 = vmatprep.subr.mxu0 %v221_v46  ;;  %418 = vmatprep.subr.mxu1 %v295_v59  ;;  %v535_v59 = vld [vmem:[#allocation8 + $0xc8] sm:$0xff] }
  0x7e   :  { %464 = vmatpush1.msra.mxu0 %v220_v48  ;;  %419 = vmatpush2.msra.mxu1 %v294_v61  ;;  %v134_v41 = vrot.slane %v129_v39, %v1208_v38  ;;  %v138_v42 = vrot.slane %v129_v39, %v1214_v40  ;;  %v534_v61 = vld [vmem:[#allocation8 + $0xc0] sm:$0xff]  ;;  %v579_v39 = vld [vmem:[#allocation8 + $0x228] sm:$0xff] }
  0x7f   :  { %465 = vmatprep.subr.mxu0 %v217_v50  ;;  %420 = vmatprep.subr.mxu1 %v291_v18  ;;  %v604_v50 = vld [vmem:[#allocation8 + $0x2f0] sm:$0xff] }
  0x80   :  { %466 = vmatpush1.msra.mxu0 %v216_v52  ;;  %421 = vmatpush2.msra.mxu1 %v290_v20  ;;  %v603_v52 = vld [vmem:[#allocation8 + $0x2e8] sm:$0xff]  ;;  %v588_v18 = vld [vmem:[#allocation8 + $0x270] sm:$0xff] }
  0x81   :  { %467 = vmatprep.subr.mxu0 %v341_v54  ;;  %422 = vmatprep.subr.mxu1 %v287_v22  ;;  %v602_v54 = vld [vmem:[#allocation8 + $0x2e0] sm:$0xff]  ;;  %v587_v20 = vld [vmem:[#allocation8 + $0x268] sm:$0xff] }
  0x82   :  { %468 = vmatpush2.msra.mxu0 %v340_v56  ;;  %423 = vmatpush2.msra.mxu1 %v286_v24  ;;  %v601_v56 = vld [vmem:[#allocation8 + $0x2d8] sm:$0xff]  ;;  %v586_v22 = vld [vmem:[#allocation8 + $0x260] sm:$0xff] }
  0x83   :  { %469 = vmatprep.subr.mxu0 %v337_v58  ;;  %424 = vmatprep.subr.mxu1 %v283_v26  ;;  %v600_v58 = vld [vmem:[#allocation8 + $0x2d0] sm:$0xff]  ;;  %v585_v24 = vld [vmem:[#allocation8 + $0x258] sm:$0xff] }
  0x84   :  { %470 = vmatpush2.msra.mxu0 %v336_v60  ;;  %425 = vmatpush2.msra.mxu1 %v282_v28  ;;  %v599_v60 = vld [vmem:[#allocation8 + $0x2c8] sm:$0xff]  ;;  %v584_v26 = vld [vmem:[#allocation8 + $0x250] sm:$0xff] }
  0x85   :  { %471 = vmatprep.subr.mxu0 %v333_v62  ;;  %426 = vmatprep.subr.mxu1 %v279_v30  ;;  %v598_v62 = vld [vmem:[#allocation8 + $0x2c0] sm:$0xff]  ;;  %v583_v28 = vld [vmem:[#allocation8 + $0x248] sm:$0xff] }
  0x86   :  { %472 = vmatpush2.msra.mxu0 %v332_v63  ;;  %427 = vmatpush2.msra.mxu1 %v278_v32  ;;  %v533_v63 = vld [vmem:[#allocation8 + $0xb8] sm:$0xff]  ;;  %v582_v30 = vld [vmem:[#allocation8 + $0x240] sm:$0xff] }
  0x87   :  { %473 = vmatprep.subr.mxu0 %v329_v0  ;;  %650 = vmatprep.subr.mxu1 %v541_v34  ;;  %v597_v0 = vld [vmem:[#allocation8 + $0x2b8] sm:$0xff]  ;;  %v580_v34 = vld [vmem:[#allocation8 + $0x230] sm:$0xff] }
  0x88   :  { %474 = vmatpush2.msra.mxu0 %v328_v1  ;;  %v532_v1 = vld [vmem:[#allocation8 + $0xb0] sm:$0xff]  ;;  %v581_v32 = vld [vmem:[#allocation8 + $0x238] sm:$0xff] }
  0x89   :  { %475 = vmatprep.subr.mxu0 %v325_v2  ;;  %v596_v2 = vld [vmem:[#allocation8 + $0x2b0] sm:$0xff] }
  0x8a   :  { %476 = vmatpush2.msra.mxu0 %v324_v3  ;;  %v531_v3 = vld [vmem:[#allocation8 + $0xa8] sm:$0xff] }
  0x8b   :  { %477 = vmatprep.subr.mxu0 %v321_v4  ;;  %v595_v4 = vld [vmem:[#allocation8 + $0x2a8] sm:$0xff] }
  0x8c   :  { %478 = vmatpush2.msra.mxu0 %v320_v5  ;;  %v530_v5 = vld [vmem:[#allocation8 + $0xa0] sm:$0xff] }
  0x8d   :  { %479 = vmatprep.subr.mxu0 %v317_v6  ;;  %v594_v6 = vld [vmem:[#allocation8 + $0x2a0] sm:$0xff] }
  0x8e   :  { %480 = vmatpush2.msra.mxu0 %v316_v7  ;;  %v529_v7 = vld [vmem:[#allocation8 + $0x98] sm:$0xff] }
  0x8f   :  { %481 = vmatprep.subr.mxu0 %v313_v8  ;;  %v593_v8 = vld [vmem:[#allocation8 + $0x298] sm:$0xff] }
  0x90   :  { %482 = vmatpush2.msra.mxu0 %v312_v9  ;;  %v528_v9 = vld [vmem:[#allocation8 + $0x90] sm:$0xff] }
  0x91   :  { %483 = vmatprep.subr.mxu0 %v309_v10  ;;  %v592_v10 = vld [vmem:[#allocation8 + $0x290] sm:$0xff] }
  0x92   :  { %484 = vmatpush2.msra.mxu0 %v308_v11  ;;  %v527_v11 = vld [vmem:[#allocation8 + $0x88] sm:$0xff] }
  0x93   :  { %485 = vmatprep.subr.mxu0 %v305_v12  ;;  %v591_v12 = vld [vmem:[#allocation8 + $0x288] sm:$0xff] }
  0x94   :  { %486 = vmatpush2.msra.mxu0 %v304_v13  ;;  %v526_v13 = vld [vmem:[#allocation8 + $0x80] sm:$0xff] }
  0x95   :  { %487 = vmatprep.subr.mxu0 %v301_v14  ;;  %v590_v14 = vld [vmem:[#allocation8 + $0x280] sm:$0xff] }
  0x96   :  { %488 = vmatpush2.msra.mxu0 %v300_v15  ;;  %v525_v15 = vld [vmem:[#allocation8 + $0x78] sm:$0xff] }
  0x97   :  { %489 = vmatprep.subr.mxu0 %v297_v16  ;;  %v589_v16 = vld [vmem:[#allocation8 + $0x278] sm:$0xff] }
  0x98   :  { %490 = vmatpush2.msra.mxu0 %v296_v17  ;;  %v524_v17 = vld [vmem:[#allocation8 + $0x70] sm:$0xff] }
  0x99   :  { %491 = vmatprep.subr.mxu0 %v293_v19  ;;  %v523_v19 = vld [vmem:[#allocation8 + $0x68] sm:$0xff] }
  0x9a   :  { %492 = vmatpush2.msra.mxu0 %v292_v21  ;;  %v522_v21 = vld [vmem:[#allocation8 + $0x60] sm:$0xff] }
  0x9b   :  { %493 = vmatprep.subr.mxu0 %v289_v23  ;;  %v521_v23 = vld [vmem:[#allocation8 + $0x58] sm:$0xff] }
  0x9c   :  { %494 = vmatpush2.msra.mxu0 %v288_v25  ;;  %v520_v25 = vld [vmem:[#allocation8 + $0x50] sm:$0xff] }
  0x9d   :  { %495 = vmatprep.subr.mxu0 %v285_v27  ;;  %v519_v27 = vld [vmem:[#allocation8 + $0x48] sm:$0xff] }
  0x9e   :  { %496 = vmatpush2.msra.mxu0 %v284_v29  ;;  %v518_v29 = vld [vmem:[#allocation8 + $0x40] sm:$0xff] }
  0x9f   :  { %497 = vmatprep.subr.mxu0 %v281_v31  ;;  %v517_v31 = vld [vmem:[#allocation8 + $0x38] sm:$0xff] }
  0xa0   :  { %498 = vmatpush2.msra.mxu0 %v280_v33  ;;  %v516_v33 = vld [vmem:[#allocation8 + $0x30] sm:$0xff] }
  0xa1   :  { %721 = vmatprep.subr.mxu0 %v605_v35  ;;  %v515_v35 = vld [vmem:[#allocation8 + $0x28] sm:$0xff] }
 0x121   :  { %v207_v43 = vpop.f32.mrf.mxu0 }
 0x122   :  { %v1218_v44 = vadd.f32 %v207_v43, %v134_v41  ;;  %v514_v41 = vld [vmem:[#allocation8 + $0x20] sm:$0xff]  ;;  %v513_v43 = vld [vmem:[#allocation8 + $0x18] sm:$0xff] }
 0x123   :  { %v209_v45 = vpop.f32.mrf.mxu0 }
 0x124   :  { %v1220_v46 = vadd.f32 %v209_v45, %v138_v42  ;;  %v212_v48 = vmax.f32 %v1218_v44, 0.0  ;;  %v578_v42 = vld [vmem:[#allocation8 + $0x220] sm:$0xff]  ;;  %v577_v45 = vld [vmem:[#allocation8 + $0x218] sm:$0xff] }
 0x126   :  { %v213_v47 = vmax.f32 %v1220_v46, 0.0 }
 0x128   :  { %428 = vmatprep.mubr.f32.mxu1 %v213_v47  ;;  %499 = vmatprep.mubr.f32.mxu0 %v213_v47  ;;  %v512_v47 = vld [vmem:[#allocation8 + $0x10] sm:$0xff] }
 0x129   :  { %429 = vmatmul.mubr.f32.vlgmr.msra.gmra.mxu1 %v212_v48  ;;  %500 = vmatmul.mubr.f32.vlgmr.msra.gmra.mxu0 %v212_v48  ;;  %v576_v48 = vld [vmem:[#allocation8 + $0x210] sm:$0xff] }
 0x12a   :  { %651 = vmatpush1.msra.mxu1 %v540_v49  ;;  %722 = vmatpush1.msra.mxu0 %v604_v50  ;;  %v511_v49 = vld [vmem:[#allocation8 + $0x8] sm:$0xff] }
 0x12b   :  { %652 = vmatprep.subr.mxu1 %v539_v51  ;;  %723 = vmatprep.subr.mxu0 %v603_v52  ;;  %v575_v50 = vld [vmem:[#allocation8 + $0x208] sm:$0xff]  ;;  %v510_v51 = vld [vmem:[#allocation8] sm:$0xff] }
 0x12c   :  { %653 = vmatpush1.msra.mxu1 %v538_v53  ;;  %724 = vmatpush1.msra.mxu0 %v602_v54  ;;  %v574_v52 = vld [vmem:[#allocation8 + $0x200] sm:$0xff]  ;;  %v573_v53 = vld [vmem:[#allocation8 + $0x1f8] sm:$0xff] }
 0x12d   :  { %654 = vmatprep.subr.mxu1 %v537_v55  ;;  %725 = vmatprep.subr.mxu0 %v601_v56  ;;  %v637_v54 = vld [vmem:[#allocation8 + $0x3f8] sm:$0xff]  ;;  %v572_v55 = vld [vmem:[#allocation8 + $0x1f0] sm:$0xff] }
 0x12e   :  { %655 = vmatpush1.msra.mxu1 %v536_v57  ;;  %726 = vmatpush1.msra.mxu0 %v600_v58  ;;  %v636_v56 = vld [vmem:[#allocation8 + $0x3f0] sm:$0xff]  ;;  %v571_v57 = vld [vmem:[#allocation8 + $0x1e8] sm:$0xff] }
 0x12f   :  { %656 = vmatprep.subr.mxu1 %v535_v59  ;;  %727 = vmatprep.subr.mxu0 %v599_v60  ;;  %v635_v58 = vld [vmem:[#allocation8 + $0x3e8] sm:$0xff]  ;;  %v570_v59 = vld [vmem:[#allocation8 + $0x1e0] sm:$0xff] }
 0x130   :  { %657 = vmatpush1.msra.mxu1 %v534_v61  ;;  %728 = vmatpush1.msra.mxu0 %v598_v62  ;;  %v634_v60 = vld [vmem:[#allocation8 + $0x3e0] sm:$0xff]  ;;  %v569_v61 = vld [vmem:[#allocation8 + $0x1d8] sm:$0xff] }
 0x131   :  { %658 = vmatprep.subr.mxu1 %v533_v63  ;;  %729 = vmatprep.subr.mxu0 %v597_v0  ;;  %v633_v62 = vld [vmem:[#allocation8 + $0x3d8] sm:$0xff]  ;;  %v568_v63 = vld [vmem:[#allocation8 + $0x1d0] sm:$0xff] }
 0x132   :  { %659 = vmatpush1.msra.mxu1 %v532_v1  ;;  %730 = vmatpush1.msra.mxu0 %v596_v2  ;;  %v632_v0 = vld [vmem:[#allocation8 + $0x3d0] sm:$0xff]  ;;  %v567_v1 = vld [vmem:[#allocation8 + $0x1c8] sm:$0xff] }
 0x133   :  { %660 = vmatprep.subr.mxu1 %v531_v3  ;;  %731 = vmatprep.subr.mxu0 %v595_v4  ;;  %v631_v2 = vld [vmem:[#allocation8 + $0x3c8] sm:$0xff]  ;;  %v566_v3 = vld [vmem:[#allocation8 + $0x1c0] sm:$0xff] }
 0x134   :  { %661 = vmatpush1.msra.mxu1 %v530_v5  ;;  %732 = vmatpush1.msra.mxu0 %v594_v6  ;;  %v630_v4 = vld [vmem:[#allocation8 + $0x3c0] sm:$0xff]  ;;  %v565_v5 = vld [vmem:[#allocation8 + $0x1b8] sm:$0xff] }
 0x135   :  { %662 = vmatprep.subr.mxu1 %v529_v7  ;;  %733 = vmatprep.subr.mxu0 %v593_v8  ;;  %v629_v6 = vld [vmem:[#allocation8 + $0x3b8] sm:$0xff]  ;;  %v564_v7 = vld [vmem:[#allocation8 + $0x1b0] sm:$0xff] }
 0x136   :  { %663 = vmatpush1.msra.mxu1 %v528_v9  ;;  %734 = vmatpush1.msra.mxu0 %v592_v10  ;;  %v628_v8 = vld [vmem:[#allocation8 + $0x3b0] sm:$0xff]  ;;  %v563_v9 = vld [vmem:[#allocation8 + $0x1a8] sm:$0xff] }
 0x137   :  { %664 = vmatprep.subr.mxu1 %v527_v11  ;;  %735 = vmatprep.subr.mxu0 %v591_v12  ;;  %v627_v10 = vld [vmem:[#allocation8 + $0x3a8] sm:$0xff]  ;;  %v562_v11 = vld [vmem:[#allocation8 + $0x1a0] sm:$0xff] }
 0x138   :  { %665 = vmatpush1.msra.mxu1 %v526_v13  ;;  %736 = vmatpush1.msra.mxu0 %v590_v14  ;;  %v626_v12 = vld [vmem:[#allocation8 + $0x3a0] sm:$0xff]  ;;  %v561_v13 = vld [vmem:[#allocation8 + $0x198] sm:$0xff] }
 0x139   :  { %666 = vmatprep.subr.mxu1 %v525_v15  ;;  %737 = vmatprep.subr.mxu0 %v589_v16  ;;  %v625_v14 = vld [vmem:[#allocation8 + $0x398] sm:$0xff]  ;;  %v560_v15 = vld [vmem:[#allocation8 + $0x190] sm:$0xff] }
 0x13a   :  { %667 = vmatpush1.msra.mxu1 %v524_v17  ;;  %738 = vmatpush1.msra.mxu0 %v588_v18  ;;  %v624_v16 = vld [vmem:[#allocation8 + $0x390] sm:$0xff]  ;;  %v559_v17 = vld [vmem:[#allocation8 + $0x188] sm:$0xff] }
 0x13b   :  { %668 = vmatprep.subr.mxu1 %v523_v19  ;;  %739 = vmatprep.subr.mxu0 %v587_v20  ;;  %v623_v18 = vld [vmem:[#allocation8 + $0x388] sm:$0xff]  ;;  %v558_v19 = vld [vmem:[#allocation8 + $0x180] sm:$0xff] }
 0x13c   :  { %669 = vmatpush1.msra.mxu1 %v522_v21  ;;  %740 = vmatpush1.msra.mxu0 %v586_v22  ;;  %v622_v20 = vld [vmem:[#allocation8 + $0x380] sm:$0xff]  ;;  %v557_v21 = vld [vmem:[#allocation8 + $0x178] sm:$0xff] }
 0x13d   :  { %670 = vmatprep.subr.mxu1 %v521_v23  ;;  %741 = vmatprep.subr.mxu0 %v585_v24  ;;  %v621_v22 = vld [vmem:[#allocation8 + $0x378] sm:$0xff]  ;;  %v556_v23 = vld [vmem:[#allocation8 + $0x170] sm:$0xff] }
 0x13e   :  { %671 = vmatpush1.msra.mxu1 %v520_v25  ;;  %742 = vmatpush1.msra.mxu0 %v584_v26  ;;  %v620_v24 = vld [vmem:[#allocation8 + $0x370] sm:$0xff]  ;;  %v555_v25 = vld [vmem:[#allocation8 + $0x168] sm:$0xff] }
 0x13f   :  { %672 = vmatprep.subr.mxu1 %v519_v27  ;;  %743 = vmatprep.subr.mxu0 %v583_v28  ;;  %v619_v26 = vld [vmem:[#allocation8 + $0x368] sm:$0xff]  ;;  %v554_v27 = vld [vmem:[#allocation8 + $0x160] sm:$0xff] }
 0x140   :  { %673 = vmatpush1.msra.mxu1 %v518_v29  ;;  %744 = vmatpush1.msra.mxu0 %v582_v30  ;;  %v618_v28 = vld [vmem:[#allocation8 + $0x360] sm:$0xff]  ;;  %v553_v29 = vld [vmem:[#allocation8 + $0x158] sm:$0xff] }
 0x141   :  { %674 = vmatprep.subr.mxu1 %v517_v31  ;;  %745 = vmatprep.subr.mxu0 %v581_v32  ;;  %v617_v30 = vld [vmem:[#allocation8 + $0x358] sm:$0xff]  ;;  %v552_v31 = vld [vmem:[#allocation8 + $0x150] sm:$0xff] }
 0x142   :  { %675 = vmatpush1.msra.mxu1 %v516_v33  ;;  %746 = vmatpush1.msra.mxu0 %v580_v34  ;;  %v616_v32 = vld [vmem:[#allocation8 + $0x350] sm:$0xff]  ;;  %v551_v33 = vld [vmem:[#allocation8 + $0x148] sm:$0xff] }
 0x143   :  { %676 = vmatprep.subr.mxu1 %v515_v35  ;;  %747 = vmatprep.subr.mxu0 %v579_v39  ;;  %v615_v34 = vld [vmem:[#allocation8 + $0x348] sm:$0xff]  ;;  %v550_v35 = vld [vmem:[#allocation8 + $0x140] sm:$0xff] }
 0x144   :  { %677 = vmatpush1.msra.mxu1 %v514_v41  ;;  %748 = vmatpush1.msra.mxu0 %v578_v42  ;;  %v614_v39 = vld [vmem:[#allocation8 + $0x340] sm:$0xff]  ;;  %v549_v41 = vld [vmem:[#allocation8 + $0x138] sm:$0xff] }
 0x145   :  { %678 = vmatprep.subr.mxu1 %v513_v43  ;;  %749 = vmatprep.subr.mxu0 %v577_v45  ;;  %v613_v42 = vld [vmem:[#allocation8 + $0x338] sm:$0xff]  ;;  %v548_v43 = vld [vmem:[#allocation8 + $0x130] sm:$0xff] }
 0x146   :  { %679 = vmatpush1.msra.mxu1 %v512_v47  ;;  %750 = vmatpush1.msra.mxu0 %v576_v48  ;;  %v612_v45 = vld [vmem:[#allocation8 + $0x330] sm:$0xff]  ;;  %v547_v47 = vld [vmem:[#allocation8 + $0x128] sm:$0xff] }
 0x147   :  { %680 = vmatprep.subr.mxu1 %v511_v49  ;;  %751 = vmatprep.subr.mxu0 %v575_v50  ;;  %v611_v48 = vld [vmem:[#allocation8 + $0x328] sm:$0xff]  ;;  %v546_v49 = vld [vmem:[#allocation8 + $0x120] sm:$0xff] }
 0x148   :  { %681 = vmatpush1.msra.mxu1 %v510_v51  ;;  %752 = vmatpush1.msra.mxu0 %v574_v52  ;;  %v610_v50 = vld [vmem:[#allocation8 + $0x320] sm:$0xff]  ;;  %v545_v51 = vld [vmem:[#allocation8 + $0x118] sm:$0xff] }
 0x149   :  { %682 = vmatprep.subr.mxu1 %v573_v53  ;;  %753 = vmatprep.subr.mxu0 %v637_v54  ;;  %v609_v52 = vld [vmem:[#allocation8 + $0x318] sm:$0xff]  ;;  %v544_v53 = vld [vmem:[#allocation8 + $0x110] sm:$0xff] }
 0x14a   :  { %683 = vmatpush2.msra.mxu1 %v572_v55  ;;  %754 = vmatpush2.msra.mxu0 %v636_v56  ;;  %v608_v54 = vld [vmem:[#allocation8 + $0x310] sm:$0xff]  ;;  %v543_v55 = vld [vmem:[#allocation8 + $0x108] sm:$0xff] }
 0x14b   :  { %684 = vmatprep.subr.mxu1 %v571_v57  ;;  %755 = vmatprep.subr.mxu0 %v635_v58  ;;  %v607_v56 = vld [vmem:[#allocation8 + $0x308] sm:$0xff]  ;;  %v542_v57 = vld [vmem:[#allocation8 + $0x100] sm:$0xff] }
 0x14c   :  { %685 = vmatpush2.msra.mxu1 %v570_v59  ;;  %756 = vmatpush2.msra.mxu0 %v634_v60  ;;  %v606_v58 = vld [vmem:[#allocation8 + $0x300] sm:$0xff]  ;;  %v827_v59 = vld [vmem:[#allocation10 + $0xf8] sm:$0xff]  ;;  %v354_v60 = vsub.s32 2, %v1205_v37 }
 0x14d   :  { %686 = vmatprep.subr.mxu1 %v569_v61  ;;  %757 = vmatprep.subr.mxu0 %v633_v62  ;;  %v342_v61 = vld [vmem:[%s1247_s4] sm:$0xf]  ;;  %v358_v62 = vsub.s32 3, %v1205_v37 }
 0x14e   :  { %687 = vmatpush2.msra.mxu1 %v568_v63  ;;  %758 = vmatpush2.msra.mxu0 %v632_v0  ;;  %v347_v63 = vrot.slane %v342_v61, %v1208_v38  ;;  %v355_v0 = vrot.slane %v342_v61, %v354_v60  ;;  %v851_v60 = vld [vmem:[#allocation10 + $0x1b8] sm:$0xff] }
 0x14f   :  { %688 = vmatprep.subr.mxu1 %v567_v1  ;;  %759 = vmatprep.subr.mxu0 %v631_v2  ;;  %v351_v1 = vrot.slane %v342_v61, %v1214_v40  ;;  %v359_v2 = vrot.slane %v342_v61, %v358_v62  ;;  %v850_v61 = vld [vmem:[#allocation10 + $0x1b0] sm:$0xff]  ;;  %v849_v62 = vld [vmem:[#allocation10 + $0x1a8] sm:$0xff] }
 0x150   :  { %689 = vmatpush2.msra.mxu1 %v566_v3  ;;  %760 = vmatpush2.msra.mxu0 %v630_v4 }
 0x151   :  { %690 = vmatprep.subr.mxu1 %v565_v5  ;;  %761 = vmatprep.subr.mxu0 %v629_v6 }
 0x152   :  { %691 = vmatpush2.msra.mxu1 %v564_v7  ;;  %762 = vmatpush2.msra.mxu0 %v628_v8 }
 0x153   :  { %692 = vmatprep.subr.mxu1 %v563_v9  ;;  %763 = vmatprep.subr.mxu0 %v627_v10 }
 0x154   :  { %693 = vmatpush2.msra.mxu1 %v562_v11  ;;  %764 = vmatpush2.msra.mxu0 %v626_v12 }
 0x155   :  { %694 = vmatprep.subr.mxu1 %v561_v13  ;;  %765 = vmatprep.subr.mxu0 %v625_v14 }
 0x156   :  { %695 = vmatpush2.msra.mxu1 %v560_v15  ;;  %766 = vmatpush2.msra.mxu0 %v624_v16  ;;  %v826_v15 = vld [vmem:[#allocation10 + $0xf0] sm:$0xff]  ;;  %v825_v16 = vld [vmem:[#allocation10 + $0xe8] sm:$0xff] }
 0x157   :  { %696 = vmatprep.subr.mxu1 %v559_v17  ;;  %767 = vmatprep.subr.mxu0 %v623_v18  ;;  %v824_v17 = vld [vmem:[#allocation10 + $0xe0] sm:$0xff]  ;;  %v823_v18 = vld [vmem:[#allocation10 + $0xd8] sm:$0xff] }
 0x158   :  { %697 = vmatpush2.msra.mxu1 %v558_v19  ;;  %768 = vmatpush2.msra.mxu0 %v622_v20  ;;  %v822_v19 = vld [vmem:[#allocation10 + $0xd0] sm:$0xff]  ;;  %v821_v20 = vld [vmem:[#allocation10 + $0xc8] sm:$0xff] }
 0x159   :  { %698 = vmatprep.subr.mxu1 %v557_v21  ;;  %769 = vmatprep.subr.mxu0 %v621_v22  ;;  %v820_v21 = vld [vmem:[#allocation10 + $0xc0] sm:$0xff]  ;;  %v819_v22 = vld [vmem:[#allocation10 + $0xb8] sm:$0xff] }
 0x15a   :  { %699 = vmatpush2.msra.mxu1 %v556_v23  ;;  %770 = vmatpush2.msra.mxu0 %v620_v24  ;;  %v818_v23 = vld [vmem:[#allocation10 + $0xb0] sm:$0xff]  ;;  %v817_v24 = vld [vmem:[#allocation10 + $0xa8] sm:$0xff] }
 0x15b   :  { %700 = vmatprep.subr.mxu1 %v555_v25  ;;  %771 = vmatprep.subr.mxu0 %v619_v26  ;;  %v816_v25 = vld [vmem:[#allocation10 + $0xa0] sm:$0xff]  ;;  %v815_v26 = vld [vmem:[#allocation10 + $0x98] sm:$0xff] }
 0x15c   :  { %701 = vmatpush2.msra.mxu1 %v554_v27  ;;  %772 = vmatpush2.msra.mxu0 %v618_v28  ;;  %v814_v27 = vld [vmem:[#allocation10 + $0x90] sm:$0xff]  ;;  %v813_v28 = vld [vmem:[#allocation10 + $0x88] sm:$0xff] }
 0x15d   :  { %702 = vmatprep.subr.mxu1 %v553_v29  ;;  %773 = vmatprep.subr.mxu0 %v617_v30  ;;  %v812_v29 = vld [vmem:[#allocation10 + $0x80] sm:$0xff]  ;;  %v811_v30 = vld [vmem:[#allocation10 + $0x78] sm:$0xff] }
 0x15e   :  { %703 = vmatpush2.msra.mxu1 %v552_v31  ;;  %774 = vmatpush2.msra.mxu0 %v616_v32  ;;  %v810_v31 = vld [vmem:[#allocation10 + $0x70] sm:$0xff]  ;;  %v809_v32 = vld [vmem:[#allocation10 + $0x68] sm:$0xff] }
 0x15f   :  { %704 = vmatprep.subr.mxu1 %v551_v33  ;;  %775 = vmatprep.subr.mxu0 %v615_v34  ;;  %v808_v33 = vld [vmem:[#allocation10 + $0x60] sm:$0xff]  ;;  %v807_v34 = vld [vmem:[#allocation10 + $0x58] sm:$0xff] }
 0x160   :  { %705 = vmatpush2.msra.mxu1 %v550_v35  ;;  %776 = vmatpush2.msra.mxu0 %v614_v39  ;;  %v806_v35 = vld [vmem:[#allocation10 + $0x50] sm:$0xff]  ;;  %v805_v39 = vld [vmem:[#allocation10 + $0x48] sm:$0xff] }
 0x161   :  { %706 = vmatprep.subr.mxu1 %v549_v41  ;;  %777 = vmatprep.subr.mxu0 %v613_v42  ;;  %v804_v41 = vld [vmem:[#allocation10 + $0x40] sm:$0xff]  ;;  %v803_v42 = vld [vmem:[#allocation10 + $0x38] sm:$0xff] }
 0x162   :  { %707 = vmatpush2.msra.mxu1 %v548_v43  ;;  %778 = vmatpush2.msra.mxu0 %v612_v45  ;;  %v802_v43 = vld [vmem:[#allocation10 + $0x30] sm:$0xff]  ;;  %v801_v45 = vld [vmem:[#allocation10 + $0x28] sm:$0xff] }
 0x163   :  { %708 = vmatprep.subr.mxu1 %v547_v47  ;;  %779 = vmatprep.subr.mxu0 %v611_v48  ;;  %v800_v47 = vld [vmem:[#allocation10 + $0x20] sm:$0xff]  ;;  %v799_v48 = vld [vmem:[#allocation10 + $0x18] sm:$0xff] }
 0x164   :  { %709 = vmatpush2.msra.mxu1 %v546_v49  ;;  %780 = vmatpush2.msra.mxu0 %v610_v50  ;;  %v798_v49 = vld [vmem:[#allocation10 + $0x10] sm:$0xff]  ;;  %v797_v50 = vld [vmem:[#allocation10 + $0x8] sm:$0xff] }
 0x165   :  { %710 = vmatprep.subr.mxu1 %v545_v51  ;;  %781 = vmatprep.subr.mxu0 %v609_v52  ;;  %v796_v51 = vld [vmem:[#allocation10] sm:$0xff]  ;;  %v859_v52 = vld [vmem:[#allocation10 + $0x1f8] sm:$0xff] }
 0x166   :  { %711 = vmatpush2.msra.mxu1 %v544_v53  ;;  %782 = vmatpush2.msra.mxu0 %v608_v54  ;;  %v858_v53 = vld [vmem:[#allocation10 + $0x1f0] sm:$0xff]  ;;  %v857_v54 = vld [vmem:[#allocation10 + $0x1e8] sm:$0xff] }
 0x167   :  { %712 = vmatprep.subr.mxu1 %v543_v55  ;;  %783 = vmatprep.subr.mxu0 %v607_v56  ;;  %v856_v55 = vld [vmem:[#allocation10 + $0x1e0] sm:$0xff]  ;;  %v855_v56 = vld [vmem:[#allocation10 + $0x1d8] sm:$0xff] }
 0x168   :  { %713 = vmatpush2.msra.mxu1 %v542_v57  ;;  %784 = vmatpush2.msra.mxu0 %v606_v58  ;;  %v854_v57 = vld [vmem:[#allocation10 + $0x1d0] sm:$0xff]  ;;  %v853_v58 = vld [vmem:[#allocation10 + $0x1c8] sm:$0xff] }
 0x169   :  { %860 = vmatprep.subr.mxu1 %v827_v59  ;;  %v852_v59 = vld [vmem:[#allocation10 + $0x1c0] sm:$0xff] }
 0x1e9   :  { %v430_v3 = vpop.f32.mrf.mxu1  ;;  %v501_v4 = vpop.f32.mrf.mxu0 }
 0x1ea   :  { %v431_v5 = vadd.f32 %v430_v3, %v347_v63  ;;  %v502_v6 = vadd.f32 %v501_v4, %v355_v0  ;;  %v848_v63 = vld [vmem:[#allocation10 + $0x1a0] sm:$0xff]  ;;  %v847_v0 = vld [vmem:[#allocation10 + $0x198] sm:$0xff] }
 0x1eb   :  { %v432_v7 = vpop.f32.mrf.mxu1  ;;  %v503_v8 = vpop.f32.mrf.mxu0  ;;  %v844_v3 = vld [vmem:[#allocation10 + $0x180] sm:$0xff]  ;;  %v843_v4 = vld [vmem:[#allocation10 + $0x178] sm:$0xff] }
 0x1ec   :  { %v433_v9 = vadd.f32 %v432_v7, %v351_v1  ;;  %v504_v10 = vadd.f32 %v503_v8, %v359_v2  ;;  %v506_v13 = vmax.f32 %v431_v5, 0.0  ;;  %v508_v14 = vmax.f32 %v502_v6, 0.0  ;;  %v846_v1 = vld [vmem:[#allocation10 + $0x190] sm:$0xff]  ;;  %v845_v2 = vld [vmem:[#allocation10 + $0x188] sm:$0xff]  ;;  %v840_v7 = vld [vmem:[#allocation10 + $0x160] sm:$0xff] }
 0x1ed   :  { %v842_v5 = vld [vmem:[#allocation10 + $0x170] sm:$0xff]  ;;  %v841_v6 = vld [vmem:[#allocation10 + $0x168] sm:$0xff]  ;;  %v839_v8 = vld [vmem:[#allocation10 + $0x158] sm:$0xff] }
 0x1ee   :  { %v507_v11 = vmax.f32 %v433_v9, 0.0  ;;  %v509_v12 = vmax.f32 %v504_v10, 0.0  ;;  %v838_v9 = vld [vmem:[#allocation10 + $0x150] sm:$0xff]  ;;  %v837_v10 = vld [vmem:[#allocation10 + $0x148] sm:$0xff] }
 0x1f0   :  { %714 = vmatprep.mubr.f32.mxu1 %v507_v11  ;;  %785 = vmatprep.mubr.f32.mxu0 %v509_v12  ;;  %v836_v11 = vld [vmem:[#allocation10 + $0x140] sm:$0xff]  ;;  %v835_v12 = vld [vmem:[#allocation10 + $0x138] sm:$0xff] }
 0x1f1   :  { %715 = vmatmul.mubr.f32.vlgmr.msra.gmra.mxu1 %v506_v13  ;;  %786 = vmatmul.mubr.f32.vlgmr.msra.gmra.mxu0 %v508_v14  ;;  %v834_v13 = vld [vmem:[#allocation10 + $0x130] sm:$0xff]  ;;  %v833_v14 = vld [vmem:[#allocation10 + $0x128] sm:$0xff] }
 0x1f2   :  { %861 = vmatpush1.msra.mxu1 %v826_v15  ;;  %v832_v15 = vld [vmem:[#allocation10 + $0x120] sm:$0xff] }
 0x1f3   :  { %862 = vmatprep.subr.mxu1 %v825_v16  ;;  %v831_v16 = vld [vmem:[#allocation10 + $0x118] sm:$0xff] }
 0x1f4   :  { %863 = vmatpush1.msra.mxu1 %v824_v17  ;;  %v830_v17 = vld [vmem:[#allocation10 + $0x110] sm:$0xff] }
 0x1f5   :  { %864 = vmatprep.subr.mxu1 %v823_v18  ;;  %v829_v18 = vld [vmem:[#allocation10 + $0x108] sm:$0xff] }
 0x1f6   :  { %865 = vmatpush1.msra.mxu1 %v822_v19  ;;  %v828_v19 = vld [vmem:[#allocation10 + $0x100] sm:$0xff] }
 0x1f7   :  { %866 = vmatprep.subr.mxu1 %v821_v20  ;;  %v638_v20 = vld [vmem:[%s1249_s6] sm:$0x3]  ;;  %s1134_s6 = smov [#allocation11]  }
 0x1f8   :  { %867 = vmatpush1.msra.mxu1 %v820_v21  ;;  %v643_v21 = vrot.slane %v638_v20, %v1208_v38  ;;  %s968_s12 = sshll.u32 %s1134_s6, 4  ;;  %s969_s12 = int_to_ptr.vmem [resolvable:$true] %s968_s12 }
 0x1f9   :  { %868 = vmatprep.subr.mxu1 %v819_v22  ;;  %v647_v22 = vrot.slane %v638_v20, %v1214_v40  ;;  %s1095_s13 = scalar_lea.vmem %s969_s12, 32  ;;  %p1100_p12 = scmp.lt.s32.totalorder %s969_s12, %s969_s12 }
 0x1fa   :  { %869 = vmatpush1.msra.mxu1 %v818_v23  ;;  %p1096_p11 = scmp.ne.s32.totalorder %s969_s12, %s1095_s13  ;;  %p1101_p13 = scmp.lt.s32.totalorder %s1095_s13, %s1095_s13 }
 0x1fb   :  { %870 = vmatprep.subr.mxu1 %v817_v24 }
 0x1fc   :  { %871 = vmatpush1.msra.mxu1 %v816_v25  ;;  %p1102_p0 = por %p1101_p13, %p1100_p12 }
 0x1fd   :  { %872 = vmatprep.subr.mxu1 %v815_v26 }
 0x1fe   :  { %873 = vmatpush1.msra.mxu1 %v814_v27  ;;  %p1103_p1 = pnand %p1102_p0, %p1096_p11 }
 0x1ff   :  { %874 = vmatprep.subr.mxu1 %v813_v28 }
 0x200   :  { %875 = vmatpush1.msra.mxu1 %v812_v29 }
 0x201   :  { %876 = vmatprep.subr.mxu1 %v811_v30 }
 0x202   :  { %877 = vmatpush1.msra.mxu1 %v810_v31 }
 0x203   :  { %878 = vmatprep.subr.mxu1 %v809_v32 }
 0x204   :  { %879 = vmatpush1.msra.mxu1 %v808_v33 }
 0x205   :  { %880 = vmatprep.subr.mxu1 %v807_v34 }
 0x206   :  { %881 = vmatpush1.msra.mxu1 %v806_v35 }
 0x207   :  { %882 = vmatprep.subr.mxu1 %v805_v39 }
 0x208   :  { %883 = vmatpush1.msra.mxu1 %v804_v41  ;;  %v1133_v41 = vmov 1966171168  }
 0x209   :  { %884 = vmatprep.subr.mxu1 %v803_v42  ;;  %v943_v42 = vunpack.c.l.s4 %v1133_v41 }
 0x20a   :  { %885 = vmatpush1.msra.mxu1 %v802_v43 }
 0x20b   :  { %886 = vmatprep.subr.mxu1 %v801_v45 }
 0x20c   :  { %887 = vmatpush1.msra.mxu1 %v800_v47  ;;  %v944_v47 = vunpack.c.0.s8 %v943_v42 }
 0x20d   :  { %888 = vmatprep.subr.mxu1 %v799_v48 }
 0x20e   :  { %889 = vmatpush1.msra.mxu1 %v798_v49 }
 0x20f   :  { %890 = vmatprep.subr.mxu1 %v797_v50 }
 0x210   :  { %891 = vmatpush1.msra.mxu1 %v796_v51 }
 0x211   :  { %892 = vmatprep.subr.mxu1 %v859_v52 }
 0x212   :  { %893 = vmatpush2.msra.mxu1 %v858_v53 }
 0x213   :  { %894 = vmatprep.subr.mxu1 %v857_v54 }
 0x214   :  { %895 = vmatpush2.msra.mxu1 %v856_v55 }
 0x215   :  { %896 = vmatprep.subr.mxu1 %v855_v56 }
 0x216   :  { %897 = vmatpush2.msra.mxu1 %v854_v57 }
 0x217   :  { %898 = vmatprep.subr.mxu1 %v853_v58 }
 0x218   :  { %899 = vmatpush2.msra.mxu1 %v852_v59 }
 0x219   :  { %900 = vmatprep.subr.mxu1 %v851_v60 }
 0x21a   :  { %901 = vmatpush2.msra.mxu1 %v850_v61 }
 0x21b   :  { %902 = vmatprep.subr.mxu1 %v849_v62 }
 0x21c   :  { %903 = vmatpush2.msra.mxu1 %v848_v63 }
 0x21d   :  { %904 = vmatprep.subr.mxu1 %v847_v0 }
 0x21e   :  { %905 = vmatpush2.msra.mxu1 %v846_v1 }
 0x21f   :  { %906 = vmatprep.subr.mxu1 %v845_v2 }
 0x220   :  { %907 = vmatpush2.msra.mxu1 %v844_v3 }
 0x221   :  { %908 = vmatprep.subr.mxu1 %v843_v4 }
 0x222   :  { %909 = vmatpush2.msra.mxu1 %v842_v5 }
 0x223   :  { %910 = vmatprep.subr.mxu1 %v841_v6 }
 0x224   :  { %911 = vmatpush2.msra.mxu1 %v840_v7 }
 0x225   :  { %912 = vmatprep.subr.mxu1 %v839_v8 }
 0x226   :  { %913 = vmatpush2.msra.mxu1 %v838_v9 }
 0x227   :  { %914 = vmatprep.subr.mxu1 %v837_v10 }
 0x228   :  { %915 = vmatpush2.msra.mxu1 %v836_v11 }
 0x229   :  { %916 = vmatprep.subr.mxu1 %v835_v12 }
 0x22a   :  { %917 = vmatpush2.msra.mxu1 %v834_v13 }
 0x22b   :  { %918 = vmatprep.subr.mxu1 %v833_v14 }
 0x22c   :  { %919 = vmatpush2.msra.mxu1 %v832_v15 }
 0x22d   :  { %920 = vmatprep.subr.mxu1 %v831_v16 }
 0x22e   :  { %921 = vmatpush2.msra.mxu1 %v830_v17 }
 0x22f   :  { %922 = vmatprep.subr.mxu1 %v829_v18 }
 0x230   :  { %923 = vmatpush2.msra.mxu1 %v828_v19 }
 0x2b1   :  { %v716_v23 = vpop.f32.mrf.mxu1  ;;  %v787_v24 = vpop.f32.mrf.mxu0 }
 0x2b2   :  { %v717_v25 = vadd.f32 %v716_v23, %v643_v21 }
 0x2b3   :  { %v718_v26 = vpop.f32.mrf.mxu1  ;;  %v789_v29 = vpop.f32.mrf.mxu0 }
 0x2b4   :  { %v788_v27 = vadd.f32 %v787_v24, %v717_v25  ;;  %v719_v28 = vadd.f32 %v718_v26, %v647_v22 }
 0x2b6   :  { %v790_v30 = vadd.f32 %v789_v29, %v719_v28  ;;  %v792_v31 = vadd.f32 %v788_v27, %v1218_v44 }
 0x2b8   :  { %v793_v32 = vadd.f32 %v790_v30, %v1220_v46  ;;  %v794_v34 = vmul.f32 %v792_v31, %v792_v31  ;;  %v947_v46 = vsub.s32 %v944_v47, %v1205_v37 }
 0x2ba   :  { %v795_v33 = vmul.f32 %v793_v32, %v793_v32 }
 0x2bc   :  { %924 = vmatprep.mubr.f32.mxu1 %v795_v33 }
 0x2bd   :  { %925 = vmatmul.mubr.f32.vlgmr.msra.gmra.mxu1 %v794_v34 }
 0x37d   :  { %v926_v35 = vpop.f32.mrf.mxu1 }
 0x37e   :  { %v931_v38 = vmax.f32 %v926_v35, 1e-24 }
 0x37f   :  { %v928_v39 = vpop.f32.mrf.mxu1 }
 0x380   :  { %991 = vrsqrt.f32 %v931_v38  ;;  %v932_v40 = vmax.f32 %v928_v39, 1e-24 }
 0x382   :  { %993 = vrsqrt.f32 %v932_v40 }
 0x38d   :  { %v992_v43 = vpop.eup %991 }
 0x38e   :  { %v935_v45 = vmul.f32 5.656854, %v992_v43 }
 0x38f   :  { %v994_v48 = vpop.eup %993 }
 0x390   :  { %v936_v49 = vmul.f32 5.656854, %v994_v48  ;;  %v937_v44 = vmul.f32 %v935_v45, %v792_v31 }
 0x392   :  { %v938_v50 = vmul.f32 %v936_v49, %v793_v32 }
 0x394   :  { %v941_v51 = vcombine.low %v937_v44, %v938_v50 }
 0x396   :  { %v948_v52 = vrot.slane %v941_v51, %v947_v46 }
 0x398   :  { %v955_v53 = vrot.slane %v948_v52, %v947_v46 }
 0x39a   :  { %961 = vst.msk [vmem:[#allocation11] sm:$0x3] %vm959_vm0, %v955_v53 }
 0x39b   :  { %1106 = shalt.err (!%p1103_p1)
}
 0x39c   :  { %971 = dma.vmem_to_hbm [thread:$0]  %s969_s12, 32, %s1251_s8, [#allocation4]  }
 0x39d   :  { %1121 = dma.done.wait [#allocation4], 32  }
 0x39e   :  { %1122 = vsyncadd [#allocation4], 4294967264 }
 0x39f   :  { %975 = vsyncpa [#allocation3], 1 }
 0x3a0   :  { %976 = vsyncpa [#allocation6], 1 }
 0x3a1   :  { %977 = vsyncpa [#allocation9], 1 }
 0x3a2   :  { %978 = vsyncpa [#allocation4], 1 }

</bundles_post_ra>
